<compile_context>
chip_gen: v6e
topology: v6e:2x2x1
jax: 0.10.0
libtpu: 0.0.40
codegen_flags: <defaults>
</compile_context>

<pallas_src>
import functools

import jax
import jax.numpy as jnp
from jax import lax
from jax.experimental import pallas as pl
from jax.experimental.pallas import tpu as pltpu


_MASK_VALUE = -1e30


def _cdiv(a, b):
    return (a + b - 1) // b


def _round_up(x, m):
    return ((x + m - 1) // m) * m


def _device_kind():
    try:
        return jax.devices()[0].device_kind.lower()
    except Exception:
        return ""


def _has_bf16_eup():
    # v6e / v7x have a bf16 EUP (and bf16 VPU); earlier generations do not.
    kind = _device_kind()
    return ("v6" in kind) or ("v7" in kind)


def _vmem_capacity_bytes():
    try:
        return int(pltpu.get_tpu_info().vmem_capacity_bytes)
    except Exception:
        # v7x: 64 MiB per TensorCore; v5e/v6e (and older): 128 MiB.
        return (64 if "v7" in _device_kind() else 128) * 1024 * 1024


def _vmem_limit_bytes():
    # Generation-aware scoped-VMEM budget with ~40% headroom for the compiler.
    return int(_vmem_capacity_bytes() * 0.6)


def _choose_tiles(q_len, k_len, bh, in_dtype):
    # bf16 packs two rows per sublane -> align to 16; f32 -> 8.
    if in_dtype == jnp.bfloat16:
        align, tq_t, tk_t = 16, 512, 1024
    else:
        align, tq_t, tk_t = 8, 256, 1024
    tq = q_len if q_len <= tq_t else tq_t
    tk = k_len if k_len <= tk_t else tk_t
    # v7x shards the "parallel" grid axes over 2 TensorCores: make sure there
    # are at least two independent (head, q-tile) work units when possible.
    if bh * _cdiv(q_len, tq) < 2:
        half = _round_up(_cdiv(q_len, 2), align)
        if 0 < half < q_len:
            tq = half
    return tq, tk


def _attend_kernel(q_ref, k_ref, v_ref, o_ref,
                   m_ref, l_ref, acc_ref, qs_ref, *,
                   scale, k_len, tk, needs_mask, mxu_dtype, exp_dtype):
    kv = pl.program_id(2)
    last_kv = pl.num_programs(2) - 1

    @pl.when(kv == 0)
    def _():
        m_ref[...] = jnp.full_like(m_ref, -jnp.inf)
        l_ref[...] = jnp.zeros_like(l_ref)
        acc_ref[...] = jnp.zeros_like(acc_ref)
        # Fold the softmax scale into q once per q-tile (constant along kv).
        qs_ref[...] = (q_ref[...].astype(jnp.float32) * scale).astype(mxu_dtype)

    q = qs_ref[...]
    k = k_ref[...].astype(mxu_dtype)
    v = v_ref[...].astype(mxu_dtype)

    # sim = q @ k^T, contracting over d (no explicit transpose copy).
    sim = lax.dot_general(q, k, (((1,), (1,)), ((), ())),
                          preferred_element_type=jnp.float32)

    def online_update(sim_t, v_t):
        m_prev = m_ref[...]
        m_new = jnp.maximum(m_prev, jnp.max(sim_t, axis=-1, keepdims=True))
        alpha = jnp.exp(m_prev - m_new)
        # exp of shifted logits on the EUP; bf16 where supported (v6e/v7x).
        p = jnp.exp((sim_t - m_new).astype(exp_dtype))
        l_ref[...] = alpha * l_ref[...] + jnp.sum(
            p.astype(jnp.float32), axis=-1, keepdims=True)
        acc_ref[...] = alpha * acc_ref[...] + lax.dot_general(
            p.astype(mxu_dtype), v_t, (((1,), (0,)), ((), ())),
            preferred_element_type=jnp.float32)
        m_ref[...] = m_new

    if needs_mask:
        # Only the last kv tile straddles k_len; all earlier tiles take the
        # mask-free path (zero per-element masking cost).
        @pl.when(kv != last_kv)
        def _():
            online_update(sim, v)

        @pl.when(kv == last_kv)
        def _():
            key_idx = kv * tk + lax.broadcasted_iota(jnp.int32, sim.shape, 1)
            sim_m = jnp.where(key_idx < k_len, sim, _MASK_VALUE)
            row_idx = kv * tk + lax.broadcasted_iota(
                jnp.int32, (v.shape[0], 1), 0)
            v_m = jnp.where(row_idx < k_len, v, jnp.zeros_like(v))
            online_update(sim_m, v_m)
    else:
        online_update(sim, v)

    @pl.when(kv == last_kv)
    def _():
        # Exact reciprocal: runs once per q-tile, precision > speed here.
        o_ref[...] = (acc_ref[...] / l_ref[...]).astype(o_ref.dtype)


def attend(q, k, v, scale=None, compute_dtype=None):
    """Pallas TPU equivalent of Attend.forward (flash=False, eval mode)."""
    b, h, q_len, d = q.shape
    k_len = k.shape[-2]
    if scale is None:
        scale = d ** (-0.5)

    if compute_dtype is None:
        compute_dtype = jnp.bfloat16          # MXU-native on every generation
    exp_dtype = compute_dtype
    if exp_dtype == jnp.bfloat16 and not _has_bf16_eup():
        exp_dtype = jnp.float32               # v5e and older: no bf16 EUP

    bh = b * h
    in_bytes = jnp.dtype(q.dtype).itemsize
    tq, tk = _choose_tiles(q_len, k_len, bh, q.dtype)
    n_q, n_k = _cdiv(q_len, tq), _cdiv(k_len, tk)
    needs_mask = (k_len % tk) != 0

    # No wrapper-side padding: leading dims merge for free, the head dim stays
    # native (block last dim == full array dim), ragged tails are handled
    # in-kernel, so q/k/v make exactly one trip through HBM.
    qf = q.reshape(bh, q_len, d)
    kf = k.reshape(bh, k_len, d)
    vf = v.reshape(bh, k_len, d)

    kernel = functools.partial(
        _attend_kernel, scale=float(scale), k_len=k_len, tk=tk,
        needs_mask=needs_mask, mxu_dtype=compute_dtype, exp_dtype=exp_dtype)

    out = pl.pallas_call(
        kernel,
        out_shape=jax.ShapeDtypeStruct((bh, q_len, d), q.dtype),
        grid_spec=pltpu.PrefetchScalarGridSpec(
            num_scalar_prefetch=0,
            grid=(bh, n_q, n_k),
            in_specs=[
                pl.BlockSpec((None, tq, d), lambda i, qi, ki: (i, qi, 0)),
                pl.BlockSpec((None, tk, d), lambda i, qi, ki: (i, ki, 0)),
                pl.BlockSpec((None, tk, d), lambda i, qi, ki: (i, ki, 0)),
            ],
            out_specs=pl.BlockSpec((None, tq, d), lambda i, qi, ki: (i, qi, 0)),
            scratch_shapes=[
                pltpu.VMEM((tq, 1), jnp.float32),     # running max
                pltpu.VMEM((tq, 1), jnp.float32),     # running denominator
                pltpu.VMEM((tq, d), jnp.float32),     # output accumulator
                pltpu.VMEM((tq, d), compute_dtype),   # scaled q (reused over kv)
            ],
        ),
        compiler_params=pltpu.CompilerParams(
            dimension_semantics=("parallel", "parallel", "arbitrary"),
            vmem_limit_bytes=_vmem_limit_bytes(),
        ),
        cost_estimate=pl.CostEstimate(
            flops=4 * bh * q_len * k_len * d,
            transcendentals=bh * q_len * k_len,
            bytes_accessed=in_bytes * bh * d * (2 * q_len + 2 * k_len),
        ),
    )(qf, kf, vf)

    return out.reshape(b, h, q_len, d)


def attend_reference(q, k, v, scale=None):
    """Pure-JAX reference matching the PyTorch forward exactly."""
    d = q.shape[-1]
    if scale is None:
        scale = d ** (-0.5)
    sim = jnp.einsum('bhid,bhjd->bhij', q, k,
                     precision=jax.lax.Precision.HIGHEST) * scale
    attn = jax.nn.softmax(sim, axis=-1)
    return jnp.einsum('bhij,bhjd->bhid', attn, v,
                      precision=jax.lax.Precision.HIGHEST)


if __name__ == "__main__":
    key = jax.random.PRNGKey(0)
    kq, kk, kv_ = jax.random.split(key, 3)

    # Small shapes consistent with "b h n d" attention.
    b, h, n, d = 2, 4, 8, 32
    q = jax.random.normal(kq, (b, h, n, d), dtype=jnp.float32)
    k = jax.random.normal(kk, (b, h, n, d), dtype=jnp.float32)
    v = jax.random.normal(kv_, (b, h, n, d), dtype=jnp.float32)

    ref = attend_reference(q, k, v)

    # Full-precision path: tight tolerance.
    out_f32 = jax.block_until_ready(attend(q, k, v, compute_dtype=jnp.float32))
    assert out_f32.shape == (b, h, n, d)
    assert jnp.allclose(out_f32, ref, atol=2e-3, rtol=2e-3), "f32 mismatch"

    # Default fast path (bf16 MXU operands, bf16 exp where supported).
    out = jax.block_until_ready(attend(q, k, v))
    assert out.shape == (b, h, n, d)
    assert jnp.allclose(out, ref, atol=5e-2, rtol=5e-2), "bf16 mismatch"

    print("KERNEL_OK")
</pallas_src>

<mosaic_0001>
module attributes {stable_mosaic.version = 11 : i64} {
  func.func @_attend_kernel(%arg0: i32, %arg1: i32, %arg2: i32, %arg3: memref<1x8x32xf32, #tpu.memory_space<vmem>>, %arg4: memref<1x8x32xf32, #tpu.memory_space<vmem>>, %arg5: memref<1x8x32xf32, #tpu.memory_space<vmem>>, %arg6: memref<1x8x32xf32, #tpu.memory_space<vmem>>, %arg7: memref<8x1xf32, #tpu.memory_space<vmem>>, %arg8: memref<8x1xf32, #tpu.memory_space<vmem>>, %arg9: memref<8x32xf32, #tpu.memory_space<vmem>>, %arg10: memref<8x32xf32, #tpu.memory_space<vmem>>) attributes {dimension_semantics = [#tpu.dimension_semantics<parallel>, #tpu.dimension_semantics<parallel>, #tpu.dimension_semantics<arbitrary>], iteration_bounds = array<i64: 8, 1, 1>, scalar_prefetch = 0 : i64, scratch_operands = 4 : i64, tpu.core_type = #tpu.core_type<tc>, window_params = [{transform_indices = @transform_0, window_bounds = array<i64: 1, 8, 32>}, {transform_indices = @transform_1, window_bounds = array<i64: 1, 8, 32>}, {transform_indices = @transform_2, window_bounds = array<i64: 1, 8, 32>}, {transform_indices = @transform_3, window_bounds = array<i64: 1, 8, 32>}]} {
    %c0_i32 = arith.constant 0 : i32
    %0 = arith.cmpi eq, %arg2, %c0_i32 : i32
    %1 = arith.extui %0 : i1 to i32
    %c0_i32_0 = arith.constant 0 : i32
    %2 = arith.cmpi ne, %1, %c0_i32_0 : i32
    scf.if %2 {
      %cst_25 = arith.constant 0xFF800000 : f32
      %34 = vector.broadcast %cst_25 : f32 to vector<8x1xf32>
      %c0_26 = arith.constant 0 : index
      %c0_27 = arith.constant 0 : index
      %35 = vector.load %arg7[%c0_26, %c0_27] : memref<8x1xf32, #tpu.memory_space<vmem>>, vector<8x1xf32>
      tpu.vector_store %arg7[%c0_26, %c0_27], %34 {strides = array<i32>} : memref<8x1xf32, #tpu.memory_space<vmem>>, vector<8x1xf32>,
      %cst_28 = arith.constant 0.000000e+00 : f32
      %36 = vector.broadcast %cst_28 : f32 to vector<8x1xf32>
      %c0_29 = arith.constant 0 : index
      %c0_30 = arith.constant 0 : index
      %37 = vector.load %arg8[%c0_29, %c0_30] : memref<8x1xf32, #tpu.memory_space<vmem>>, vector<8x1xf32>
      tpu.vector_store %arg8[%c0_29, %c0_30], %36 {strides = array<i32>} : memref<8x1xf32, #tpu.memory_space<vmem>>, vector<8x1xf32>,
      %cst_31 = arith.constant 0.000000e+00 : f32
      %38 = vector.broadcast %cst_31 : f32 to vector<8x32xf32>
      %c0_32 = arith.constant 0 : index
      %c0_33 = arith.constant 0 : index
      %39 = vector.load %arg9[%c0_32, %c0_33] : memref<8x32xf32, #tpu.memory_space<vmem>>, vector<8x32xf32>
      tpu.vector_store %arg9[%c0_32, %c0_33], %38 {strides = array<i32>} : memref<8x32xf32, #tpu.memory_space<vmem>>, vector<8x32xf32>,
      %c0_34 = arith.constant 0 : index
      %c0_35 = arith.constant 0 : index
      %c0_36 = arith.constant 0 : index
      %40 = vector.load %arg3[%c0_34, %c0_35, %c0_36] : memref<1x8x32xf32, #tpu.memory_space<vmem>>, vector<1x8x32xf32>
      %41 = vector.shape_cast %40 : vector<1x8x32xf32> to vector<8x32xf32>
      %cst_37 = arith.constant 0.176776692 : f32
      %42 = vector.broadcast %cst_37 : f32 to vector<8x32xf32>
      %43 = arith.mulf %41, %42 : vector<8x32xf32>
      %c0_38 = arith.constant 0 : index
      %c0_39 = arith.constant 0 : index
      %44 = vector.load %arg10[%c0_38, %c0_39] : memref<8x32xf32, #tpu.memory_space<vmem>>, vector<8x32xf32>
      tpu.vector_store %arg10[%c0_38, %c0_39], %43 {strides = array<i32>} : memref<8x32xf32, #tpu.memory_space<vmem>>, vector<8x32xf32>,
    } else {
    }
    %c0 = arith.constant 0 : index
    %c0_1 = arith.constant 0 : index
    %3 = vector.load %arg10[%c0, %c0_1] : memref<8x32xf32, #tpu.memory_space<vmem>>, vector<8x32xf32>
    %c0_2 = arith.constant 0 : index
    %c0_3 = arith.constant 0 : index
    %c0_4 = arith.constant 0 : index
    %4 = vector.load %arg4[%c0_2, %c0_3, %c0_4] : memref<1x8x32xf32, #tpu.memory_space<vmem>>, vector<1x8x32xf32>
    %5 = vector.shape_cast %4 : vector<1x8x32xf32> to vector<8x32xf32>
    %c0_5 = arith.constant 0 : index
    %c0_6 = arith.constant 0 : index
    %c0_7 = arith.constant 0 : index
    %6 = vector.load %arg5[%c0_5, %c0_6, %c0_7] : memref<1x8x32xf32, #tpu.memory_space<vmem>>, vector<1x8x32xf32>
    %7 = vector.shape_cast %6 : vector<1x8x32xf32> to vector<8x32xf32>
    %cst = arith.constant dense<0.000000e+00> : vector<8x8xf32>
    %8 = tpu.matmul %3, %5, %cst {dimension_numbers = #tpu.dot_dimension_numbers<[1], [1], [0], [0], [0, 0, 1, 0], [], []>} : vector<8x32xf32>, vector<8x32xf32>, vector<8x8xf32> -> vector<8x8xf32>
    %c0_8 = arith.constant 0 : index
    %c0_9 = arith.constant 0 : index
    %9 = vector.load %arg7[%c0_8, %c0_9] : memref<8x1xf32, #tpu.memory_space<vmem>>, vector<8x1xf32>
    %cst_10 = arith.constant dense<0xFF800000> : vector<8xf32>
    %10 = vector.multi_reduction <maximumf>, %8, %cst_10 [1] : vector<8x8xf32> to vector<8xf32>
    %11 = vector.shape_cast %10 : vector<8xf32> to vector<8x1xf32>
    %12 = arith.maximumf %9, %11 : vector<8x1xf32>
    %13 = arith.subf %9, %12 : vector<8x1xf32>
    %14 = math.exp %13 : vector<8x1xf32>
    %15 = vector.broadcast %12 : vector<8x1xf32> to vector<8x8xf32>
    %16 = arith.subf %8, %15 : vector<8x8xf32>
    %17 = math.exp %16 : vector<8x8xf32>
    %c0_11 = arith.constant 0 : index
    %c0_12 = arith.constant 0 : index
    %18 = vector.load %arg8[%c0_11, %c0_12] : memref<8x1xf32, #tpu.memory_space<vmem>>, vector<8x1xf32>
    %19 = arith.mulf %14, %18 : vector<8x1xf32>
    %cst_13 = arith.constant dense<0.000000e+00> : vector<8xf32>
    %20 = vector.multi_reduction <add>, %17, %cst_13 [1] : vector<8x8xf32> to vector<8xf32>
    %21 = vector.shape_cast %20 : vector<8xf32> to vector<8x1xf32>
    %22 = arith.addf %19, %21 : vector<8x1xf32>
    %c0_14 = arith.constant 0 : index
    %c0_15 = arith.constant 0 : index
    %23 = vector.load %arg8[%c0_14, %c0_15] : memref<8x1xf32, #tpu.memory_space<vmem>>, vector<8x1xf32>
    tpu.vector_store %arg8[%c0_14, %c0_15], %22 {strides = array<i32>} : memref<8x1xf32, #tpu.memory_space<vmem>>, vector<8x1xf32>,
    %c0_16 = arith.constant 0 : index
    %c0_17 = arith.constant 0 : index
    %24 = vector.load %arg9[%c0_16, %c0_17] : memref<8x32xf32, #tpu.memory_space<vmem>>, vector<8x32xf32>
    %25 = vector.broadcast %14 : vector<8x1xf32> to vector<8x32xf32>
    %26 = arith.mulf %25, %24 : vector<8x32xf32>
    %cst_18 = arith.constant dense<0.000000e+00> : vector<8x32xf32>
    %27 = tpu.matmul %17, %7, %cst_18 {dimension_numbers = #tpu.dot_dimension_numbers<[1], [0], [0], [1], [0, 0, 1, 1], [], []>} : vector<8x8xf32>, vector<8x32xf32>, vector<8x32xf32> -> vector<8x32xf32>
    %28 = arith.addf %26, %27 : vector<8x32xf32>
    %c0_19 = arith.constant 0 : index
    %c0_20 = arith.constant 0 : index
    %29 = vector.load %arg9[%c0_19, %c0_20] : memref<8x32xf32, #tpu.memory_space<vmem>>, vector<8x32xf32>
    tpu.vector_store %arg9[%c0_19, %c0_20], %28 {strides = array<i32>} : memref<8x32xf32, #tpu.memory_space<vmem>>, vector<8x32xf32>,
    %c0_21 = arith.constant 0 : index
    %c0_22 = arith.constant 0 : index
    %30 = vector.load %arg7[%c0_21, %c0_22] : memref<8x1xf32, #tpu.memory_space<vmem>>, vector<8x1xf32>
    tpu.vector_store %arg7[%c0_21, %c0_22], %12 {strides = array<i32>} : memref<8x1xf32, #tpu.memory_space<vmem>>, vector<8x1xf32>,
    %c0_i32_23 = arith.constant 0 : i32
    %31 = arith.cmpi eq, %arg2, %c0_i32_23 : i32
    %32 = arith.extui %31 : i1 to i32
    %c0_i32_24 = arith.constant 0 : i32
    %33 = arith.cmpi ne, %32, %c0_i32_24 : i32
    scf.if %33 {
      %c0_25 = arith.constant 0 : index
      %c0_26 = arith.constant 0 : index
      %34 = vector.load %arg9[%c0_25, %c0_26] : memref<8x32xf32, #tpu.memory_space<vmem>>, vector<8x32xf32>
      %c0_27 = arith.constant 0 : index
      %c0_28 = arith.constant 0 : index
      %35 = vector.load %arg8[%c0_27, %c0_28] : memref<8x1xf32, #tpu.memory_space<vmem>>, vector<8x1xf32>
      %36 = vector.broadcast %35 : vector<8x1xf32> to vector<8x32xf32>
      %37 = arith.divf %34, %36 : vector<8x32xf32>
      %c0_29 = arith.constant 0 : index
      %c0_30 = arith.constant 0 : index
      %c0_31 = arith.constant 0 : index
      %38 = vector.load %arg6[%c0_29, %c0_30, %c0_31] : memref<1x8x32xf32, #tpu.memory_space<vmem>>, vector<1x8x32xf32>
      %39 = vector.shape_cast %38 : vector<1x8x32xf32> to vector<8x32xf32>
      %40 = vector.shape_cast %37 : vector<8x32xf32> to vector<1x8x32xf32>
      tpu.vector_store %arg6[%c0_29, %c0_30, %c0_31], %40 {strides = array<i32>} : memref<1x8x32xf32, #tpu.memory_space<vmem>>, vector<1x8x32xf32>,
    } else {
    }
    return
  }
  func.func @transform_0(%arg0: i32, %arg1: i32, %arg2: i32) -> (i32, i32, i32) {
    %c0_i32 = arith.constant 0 : i32
    %c0_i32_0 = arith.constant 0 : i32
    return %arg0, %arg1, %c0_i32 : i32, i32, i32
  }
  func.func @transform_1(%arg0: i32, %arg1: i32, %arg2: i32) -> (i32, i32, i32) {
    %c0_i32 = arith.constant 0 : i32
    %c0_i32_0 = arith.constant 0 : i32
    return %arg0, %arg2, %c0_i32 : i32, i32, i32
  }
  func.func @transform_2(%arg0: i32, %arg1: i32, %arg2: i32) -> (i32, i32, i32) {
    %c0_i32 = arith.constant 0 : i32
    %c0_i32_0 = arith.constant 0 : i32
    return %arg0, %arg2, %c0_i32 : i32, i32, i32
  }
  func.func @transform_3(%arg0: i32, %arg1: i32, %arg2: i32) -> (i32, i32, i32) {
    %c0_i32 = arith.constant 0 : i32
    %c0_i32_0 = arith.constant 0 : i32
    return %arg0, %arg1, %c0_i32 : i32, i32, i32
  }
}

</mosaic_0001>

<bundles_post_ra>
// kernel: tpu_custom_call.1
= control target key start
LH: loop header
LB: loop body
LE: loop exit
PB: predicated region body
PF: predicated region fallthrough
CT: control target
= control target key end

     0   :  { %s1170_s0 = inlined_call_operand.hbm [shape: f32[8,8,32], index: 0, kind: input, shape index: {}]   ;;  %s1171_s1 = inlined_call_operand.hbm [shape: f32[8,8,32], index: 1, kind: input, shape index: {}]   ;;  %s1172_s2 = inlined_call_operand.hbm [shape: f32[8,8,32], index: 2, kind: input, shape index: {}]   ;;  %s1173_s3 = inlined_call_operand.hbm [shape: f32[8,8,32], index: 3, kind: output, shape index: {}]  }
   0x1   :  { %1177 = sst [smem:[#allocation18_spill]] %s1171_s1 }
   0x2   :  { %8 = vsyncpa [#allocation7], 0 }
   0x3   :  { %10 = vsyncpa [#allocation7 + $0x1], 0 }
   0x4   :  { %11 = vsyncpa [#allocation10], 0 }
   0x5   :  { %13 = vsyncpa [#allocation10 + $0x1], 0 }
   0x6   :  { %14 = vsyncpa [#allocation8], 0 }
   0x7   :  { %16 = vsyncpa [#allocation8 + $0x1], 0  ;;  %s961_s12 = smov 0   ;;  %s963_s13 = smov 0  }
   0x8   :  { %s965_s14 = smov 0   ;;  %s967_s15 = smov 0  }
   0x9   :  { %s969_s16 = smov 0   ;;  %s971_s17 = smov 0  }
   0xa LB: > { %1178 = sst [smem:[#allocation16_spill]] %s927_s16  ;;  %s992_s18 = sadd.s32 4294967295, %s931_s17   ;;  %s931_s17 = sphi %s971_s17, %s22_s17   ;;  %s927_s16 = sphi %s969_s16, %s1189_s16   ;;  %s923_s15 = sphi %s967_s15, %s1188_s15   ;;  %s919_s14 = sphi %s965_s14, %s1192_s14   ;;  %s915_s13 = sphi %s963_s13, %s1191_s13   ;;  %s911_s12 = sphi %s961_s12, %s1190_s12  }
   0xb   : > { %s644_s19 = sadd.s32 4294967294, %s931_s17   ;;  %s41_s20 = sadd.s32 1, %s927_s16 }
   0xc   : > { %s50_s21 = sadd.s32 1, %s919_s14  ;;  %p43_p0 = scmp.ge.s32.totalorder %s41_s20, 8 }
   0xd   : > { %p57_p1 = scmp.ne.s32.totalorder %s919_s14, %s915_s13  ;;  %p58_p2 = scmp.eq.s32.totalorder %s931_s17, 0 }
   0xe   : > { %p63_p3 = scmp.ne.s32.totalorder %s915_s13, %s911_s12  ;;  %s1194_s20 = smov (%p43_p0, %s41_s20), 0 }
   0xf   : > { %1179 = sst [smem:[#allocation17_spill]] %s1194_s20  ;;  %p1004_p4 = por %p58_p2, %p57_p1 }
  0x10   : > { %p64_p5 = scmp.eq.s32.totalorder %s992_s18, 0  ;;  %s45_s23 = ssub.s32 %s927_s16, %s1194_s20 }
  0x11   : > { %p145_p6 = scmp.eq.s32.totalorder %s992_s18, 7  ;;  %p48_p7 = scmp.eq.s32.totalorder %s45_s23, 0 }
  0x12   : > { %p1012_p8 = por %p64_p5, %p63_p3  ;;  %p151_p10 = scmp.eq.s32.totalorder %s644_s19, 7 }
  0x13   : > { %p1016_p9 = por %p145_p6, %p57_p1  ;;  %p701_p12 = scmp.lt.s32.totalorder %s931_s17, 8 }
  0x14   : > { %s1021_s26 = scalar_select %p48_p7, %s919_s14, %s50_s21  }
  0x15   : > { %p1023_p11 = por %p151_p10, %p63_p3  ;;  %s1174_s28 = sand.u32 1, %s919_s14  }
  0x16   : > { %s1031_s29 = sshll.u32 %s1174_s28, 3  ;;  %s1034_s30 = sshll.u32 %s927_s16, 7 }
  0x17   : > { %p1038_p13 = pnand %p701_p12, %p1004_p4  ;;  %s190_s5 = sand.u32 1, %s931_s17  }
  0x18   : > { %s1185_s1 = sld [smem:[#allocation18_spill]]  ;;  %s194_s9 = scalar_lea.vmem [#allocation9], %s1031_s29 }
  0x19   : > { %s202_s10 = sshll.u32 %s194_s9, 4  ;;  %p653_p0 = scmp.ge.s32.totalorder %s931_s17, 1  ;;  %s203_s10 = int_to_ptr.vmem [resolvable:$true] %s202_s10 }
  0x1a   : > { %p226_p1 = scmp.lt.s32.totalorder %s931_s17, 9  ;;  %s1050_s11 = scalar_lea.sflag [#allocation10], %s190_s5 }
  0x1b   : > { %p765_p2 = pneg %p1038_p13  ;;  %s776_s19 = scalar_lea.vmem %s203_s10, 128 }
  0x1c   : > { %p777_p3 = scmp.ne.s32.totalorder %s203_s10, %s776_s19  ;;  %s933_s21 = smov [#allocation9]  }
  0x1d   : > { %s781_s22 = sshll.u32 %s933_s21, 4  ;;  %s782_s22 = int_to_ptr.vmem [resolvable:$false] %s781_s22 }
  0x1e   : > { %s200_s8 = scalar_lea.hbm %s1185_s1, %s1034_s30  ;;  %p779_p4 = pnand %p777_p3, %p765_p2 }
  0x1f   : > { %s783_s23 = scalar_lea.vmem %s782_s22, 256  ;;  %p784_p6 = scmp.lt.s32.totalorder %s203_s10, %s782_s22 }
  0x20   : > { %p780_p5 = pneg %p779_p4  ;;  %p785_p7 = scmp.lt.s32.totalorder %s783_s23, %s776_s19 }
  0x22   : > { %p786_p10 = por %p785_p7, %p784_p6 }
  0x24   : > { %p787_p12 = pnand %p786_p10, %p780_p5 }
  0x26   : > { %790 = shalt.err (!%p787_p12)
}
  0x27   : > { %693 = dma.hbm_to_vmem [thread:$0]  (!%p1038_p13), %s200_s8, 128, %s203_s10, %s1050_s11  }
  0x28   : > { %p1064_p3 = pnand %p653_p0, %p226_p1  ;;  %s181_s9 = scalar_lea.hbm %s1170_s0, %s1034_s30 }
  0x29   : > { %s175_s19 = scalar_lea.vmem [#allocation6], %s1031_s29  ;;  %s219_s28 = scalar_lea.hbm %s1172_s2, %s1034_s30 }
  0x2a   : > { %s183_s21 = sshll.u32 %s175_s19, 4  ;;  %s1187_s1 = sand.u32 1, %s919_s14   ;;  %s184_s21 = int_to_ptr.vmem [resolvable:$true] %s183_s21 }
  0x2b   : > { %s172_s20 = scalar_lea.sflag [#allocation7], %s1187_s1  ;;  %s804_s8 = scalar_lea.vmem %s184_s21, 128 }
  0x2c   : > { %p805_p4 = scmp.ne.s32.totalorder %s184_s21, %s804_s8  ;;  %s934_s10 = smov [#allocation6]  }
  0x2d   : > { %s809_s16 = sshll.u32 %s934_s10, 4  ;;  %s810_s16 = int_to_ptr.vmem [resolvable:$false] %s809_s16 }
  0x2e   : > { %p807_p0 = pnand %p805_p4, %p765_p2  ;;  %s811_s6 = scalar_lea.vmem %s810_s16, 256 }
  0x2f   : > { %p812_p5 = scmp.lt.s32.totalorder %s184_s21, %s810_s16  ;;  %p813_p6 = scmp.lt.s32.totalorder %s811_s6, %s804_s8 }
  0x30   : > { %p808_p1 = pneg %p807_p0 }
  0x31   : > { %p814_p7 = por %p813_p6, %p812_p5 }
  0x33   : > { %p815_p10 = pnand %p814_p7, %p808_p1 }
  0x35   : > { %818 = shalt.err (!%p815_p10)
}
  0x36   : > { %690 = dma.hbm_to_vmem [thread:$0]  (!%p1038_p13), %s181_s9, 128, %s184_s21, %s172_s20  }
  0x37   : > { %s213_s1 = scalar_lea.vmem [#allocation11], %s1031_s29  ;;  %s935_s22 = smov [#allocation11]  }
  0x38   : > { %s221_s7 = sshll.u32 %s213_s1, 4  ;;  %s837_s16 = sshll.u32 %s935_s22, 4  ;;  %s222_s7 = int_to_ptr.vmem [resolvable:$true] %s221_s7  ;;  %s838_s16 = int_to_ptr.vmem [resolvable:$false] %s837_s16 }
  0x39   : > { %s832_s19 = scalar_lea.vmem %s222_s7, 128  ;;  %s839_s23 = scalar_lea.vmem %s838_s16, 256 }
  0x3a   : > { %p833_p12 = scmp.ne.s32.totalorder %s222_s7, %s832_s19  ;;  %p840_p1 = scmp.lt.s32.totalorder %s222_s7, %s838_s16 }
  0x3b   : > { %p841_p5 = scmp.lt.s32.totalorder %s839_s23, %s832_s19 }
  0x3c   : > { %p835_p4 = pnand %p833_p12, %p765_p2 }
  0x3d   : > { %p842_p6 = por %p841_p5, %p840_p1 }
  0x3e   : > { %p836_p0 = pneg %p835_p4 }
  0x40   : > { %p843_p7 = pnand %p842_p6, %p836_p0 }
  0x42   : > { %846 = shalt.err (!%p843_p7)
}
  0x43   : > { %696 = dma.hbm_to_vmem [thread:$0]  (!%p1038_p13), %s219_s28, 128, %s222_s7, %s1050_s11  }
  0x44   : > { %230 = sbr.rel (%p1064_p3) target bundleno = 868 (0x364), region = 32  ;;  %s1099_s9 = sand.u32 (!%p1064_p3), 1, %s915_s13  }
  0x45   : > { %s1102_s21 = sshll.u32 (!%p1064_p3), %s1099_s9, 3  ;;  %s233_s4 = scalar_lea.sflag (!%p1064_p3), [#allocation7], %s1099_s9 }
  0x46   : > { %s236_s8 = scalar_lea.vmem (!%p1064_p3), [#allocation6], %s1102_s21 }
  0x49   : > { %898 = dma.done.wait (%p1012_p8), %s233_s4, 128  }
  0x4a   : > { %900 = vsyncadd (%p1012_p8), %s233_s4, 4294967168  ;;  %s241_s28 = sand.u32 1, %s992_s18   ;;  %s245_s11 = scalar_lea.vmem [#allocation9], %s1102_s21 }
  0x4b   : > { %s242_s30 = scalar_lea.sflag [#allocation10], %s241_s28 }
  0x4c   : > { %902 = dma.done.wait (%p1012_p8), %s242_s30, 256  }
  0x4d   : > { %904 = vsyncadd (%p1012_p8), %s242_s30, 4294967040  ;;  %vm294_vm0 = vcmask 261120   ;;  %v936_v0 = vmov 0.0   ;;  %vm937_vm1 = vmmov 0   ;;  %v296_v1 = vld [vmem:[%s236_s8] sm:$0xff]  ;;  %v300_v2 = vld [vmem:[%s245_s11] sm:$0xff] }
  0x4e   : > { %669 = vmatprep.subr.mxu0 %v936_v0  ;;  %295 = vst.msk [vmem:[#allocation4] sm:$0xff] %vm294_vm0, %v936_v0  ;;  %671 = vmatprep.mubr.msk.f32.mxu0 %vm937_vm1, %v936_v0  ;;  %v297_v3 = vmul.f32 0.17677669, %v296_v1  ;;  %vm291_vm2 = vcmask 7168   ;;  %v938_v5 = vmov -inf   ;;  %vm380_vm3 = vcmask 64512  }
  0x4f   : > { %674 = vmatprep.subr.mxu1 %v936_v0  ;;  %676 = vmatprep.mubr.msk.f32.mxu1 %vm937_vm1, %v936_v0  ;;  %292 = vst.msk [vmem:[#allocation2] sm:$0xff] %vm291_vm2, %v938_v5  ;;  %293 = vst.msk [vmem:[#allocation3] sm:$0xff] %vm291_vm2, %v936_v0  ;;  %v939_v9 = vmov 0   ;;  %s254_s18 = scalar_lea.vmem [#allocation11], %s1102_s21  ;;  %s662_s24 = sshll.u32 %s923_s15, 7 }
  0x50   : > { %670 = vmatpush3.xpose.msk.msra.mxu0 %vm294_vm0, %v300_v2  ;;  %298 = vst.msk [vmem:[#allocation5] sm:$0xff] %vm294_vm0, %v297_v3  ;;  %755 = vset.pattern.permute.xlu0 %v939_v9  ;;  %v301_v14 = vld [vmem:[%s254_s18] sm:$0xff]  ;;  %s286_s5 = scalar_lea.vmem [#allocation12], %s1102_s21  ;;  %s513_s7 = scalar_lea.hbm %s1173_s3, %s662_s24 }
  0x51   : > { %756 = vset.pattern.permute.xlu1 %v939_v9  ;;  %675 = vmatpush3.msra.mxu1 %v301_v14  ;;  %s515_s10 = sshll.u32 %s286_s5, 4  ;;  %s501_s19 = scalar_lea.sflag [#allocation8], %s1099_s9  ;;  %s516_s10 = int_to_ptr.vmem [resolvable:$true] %s515_s10 }
  0x52   : > { %s847_s22 = scalar_lea.vmem %s516_s10, 128  ;;  %s940_s16 = smov [#allocation12]  }
  0x53   : > { %p848_p8 = scmp.ne.s32.totalorder %s516_s10, %s847_s22  ;;  %s851_s15 = sshll.u32 %s940_s16, 4  ;;  %s852_s15 = int_to_ptr.vmem [resolvable:$false] %s851_s15 }
  0x54   : > { %s853_s23 = scalar_lea.vmem %s852_s15, 256  ;;  %p854_p3 = scmp.lt.s32.totalorder %s516_s10, %s852_s15 }
  0x55   : > { %v404_v30 = vld [vmem:[#allocation4] sm:$0xff]  ;;  %p849_p13 = pnand %p848_p8, %p1016_p9  ;;  %p855_p10 = scmp.lt.s32.totalorder %s853_s23, %s847_s22 }
  0x56   : > { %v379_v10 = vld [vmem:[#allocation2] sm:$0xff]  ;;  %v396_v22 = vld [vmem:[#allocation3] sm:$0xff] }
  0x57   : > { %v299_v4 = vld [vmem:[#allocation5] sm:$0xff]  ;;  %p850_p2 = pneg %p849_p13  ;;  %p856_p12 = por %p855_p10, %p854_p3 }
  0x58   : > { %672 = vmatmul.mubr.msk.f32.vlgmr.msra.gmra.mxu0 %vm294_vm0, %v299_v4 }
  0x59   : > { %p857_p4 = pnand %p856_p12, %p850_p2 }
 0x118   : > { %v375_v6 = vpop.f32.mrf.mxu0 }
 0x119   : > { %v381_v7 = vsel %vm380_vm3, %v375_v6, -inf }
 0x11a   : > { %382 = vmax.xlane.f32.xlu0 %v381_v7  ;;  %v673_v8 = vpop.f32.mrf.mxu0 }
 0x1a3   : > { %v383_v11 = vpop.xlane.xlu0 %382 }
 0x1a4   : > { %v384_v12 = vmax.f32 %v379_v10, %v383_v11 }
 0x1a6   : > { %v385_v13 = vsub.f32 %v379_v10, %v384_v12  ;;  %486 = vst.msk [vmem:[#allocation2] sm:$0xff] %vm291_vm2, %v384_v12  ;;  %390 = vperm.xlu0 %755, %v384_v12  }
 0x1a8   : > { %v386_v20 = vmul.f32 1.442695, %v385_v13 }
 0x221   : > { %v391_v15 = vpop.permute.xlu0 %390 }
 0x222   : > { %v393_v16 = vsub.f32 %v375_v6, %v391_v15 }
 0x224   : > { %v394_v17 = vmul.f32 1.442695, %v393_v16 }
 0x226   : > { %757 = vpow2.f32 %v394_v17 }
 0x227   : > { %759 = vpow2.f32 %v386_v20 }
 0x233   : > { %v758_v18 = vpop.eup %757 }
 0x234   : > { %677 = vmatmul.mubr.msk.f32.vlgmr.msra.gmra.mxu1 %vm380_vm3, %v758_v18  ;;  %v398_v19 = vsel %vm380_vm3, %v758_v18, 0.0  ;;  %v760_v21 = vpop.eup %759 }
 0x235   : > { %399 = vadd.xlane.f32.xlu1 %v398_v19  ;;  %v397_v23 = vmul.f32 %v760_v21, %v396_v22 }
 0x2be   : > { %v400_v24 = vpop.xlane.xlu1 %399 }
 0x2bf   : > { %v401_v25 = vadd.f32 %v400_v24, %v397_v23 }
 0x2c1   : > { %403 = vst.msk [vmem:[#allocation3] sm:$0xff] %vm291_vm2, %v401_v25 }
 0x2c8   : > { %v491_v26 = vld [vmem:[#allocation3] sm:$0xff] }
 0x2c9   : > { %494 = vperm.xlu1 %756, %v491_v26  }
 0x2cd   : > { %407 = vperm.xlu1 %756, %v760_v21  }
 0x2f4   : > { %v480_v27 = vpop.f32.mrf.mxu1 }
 0x2f6   : > { %v678_v28 = vpop.f32.mrf.mxu1 }
 0x344   : > { %v495_v29 = vpop.permute.xlu1 %494 }
 0x345   : > { %761 = vrcp.f32 %v495_v29 }
 0x348   : > { %v408_v31 = vpop.permute.xlu1 %407 }
 0x349   : > { %v410_v32 = vmul.f32 %v408_v31, %v404_v30 }
 0x34b   : > { %v484_v33 = vadd.f32 %v480_v27, %v410_v32 }
 0x34d   : > { %485 = vst.msk [vmem:[#allocation4] sm:$0xff] %vm294_vm0, %v484_v33 }
 0x352   : > { %v762_v34 = vpop.eup %761 }
 0x354   : > { %v490_v35 = vld [vmem:[#allocation4] sm:$0xff] }
 0x355   : > { %v498_v36 = vmul.f32 %v762_v34, %v490_v35 }
 0x357   : > { %499 = vst.msk [vmem:[%s286_s5] sm:$0xff] %vm294_vm0, %v498_v36 }
 0x358   : > { %860 = shalt.err (!%p857_p4)
}
 0x359   : > { %s861_s20 = scalar_lea.hbm %s513_s7, 128  ;;  %s865_s21 = scalar_lea.hbm %s1173_s3, 1024 }
 0x35a   : > { %p862_p0 = scmp.ne.s32.totalorder %s513_s7, %s861_s20  ;;  %p866_p6 = scmp.lt.s32.totalorder %s513_s7, %s1173_s3 }
 0x35b   : > { %p867_p7 = scmp.lt.s32.totalorder %s865_s21, %s861_s20 }
 0x35c   : > { %p863_p1 = pnand %p862_p0, %p1016_p9 }
 0x35d   : > { %p868_p8 = por %p867_p7, %p866_p6 }
 0x35e   : > { %p864_p5 = pneg %p863_p1 }
 0x360   : > { %p869_p13 = pnand %p868_p8, %p864_p5 }
 0x362   : > { %872 = shalt.err (!%p869_p13)
}
 0x363   : > { %685 = dma.vmem_to_hbm [thread:$0]  (%p1016_p9), %s516_s10, 128, %s513_s7, %s501_s19  }
 0x364 PF: > { %p702_p2 = scmp.ge.s32.totalorder %s931_s17, 2  ;;  %s527_s28 = sand.u32 1, %s911_s12  }
 0x365   : > { %s528_s30 = scalar_lea.sflag [#allocation8], %s527_s28 }
 0x366   : > { %p698_p3 = pnand %p702_p2, %p1023_p11 }
 0x368   : > { %p699_p10 = pneg %p698_p3 }
 0x36a   : > { %906 = dma.done.wait (%p699_p10), %s528_s30, 128  }
 0x36b   : > { %908 = vsyncadd (%p699_p10), %s528_s30, 4294967168  ;;  %s22_s17 = sadd.s32 1, %s931_s17   ;;  %s1188_s15 = sld [smem:[#allocation16_spill]] }
 0x36c   : > { %p19_p12 = scmp.ge.s32.totalorder %s22_s17, 10   ;;  %s1189_s16 = sld [smem:[#allocation17_spill]] }
 0x36d   : > { %s1190_s12 = smov %s915_s13  ;;  %s1191_s13 = smov %s919_s14 }
 0x36e   : > { %s1192_s14 = smov %s1021_s26  ;;  %21 = sbr.rel (!%p19_p12) target bundleno = 10 (0xa), region = 109 }
 0x373   :  { %533 = vsyncpa [#allocation7], 1 }
 0x374   :  { %535 = vsyncpa [#allocation7 + $0x1], 1 }
 0x375   :  { %536 = vsyncpa [#allocation10], 1 }
 0x376   :  { %538 = vsyncpa [#allocation10 + $0x1], 1 }
 0x377   :  { %539 = vsyncpa [#allocation8], 1 }
 0x378   :  { %541 = vsyncpa [#allocation8 + $0x1], 1 }

</bundles_post_ra>
